<compile_context>
chip_gen: v7x
topology: tpu7x:2x2x1
jax: 0.10.0
libtpu: 0.0.40
codegen_flags: <defaults>
</compile_context>

<pallas_src>
import functools
import math

import jax
import jax.numpy as jnp
from jax.experimental import pallas as pl
from jax.experimental.pallas import tpu as pltpu


# TODO(synk): set to jnp.bfloat16 on v6e/v7x once hidden sizes make the stage
# MXU-bound; accumulation stays f32 via preferred_element_type.
_MXU_DTYPE = jnp.float32


def _mm(a, b):
    """MXU matmul with f32 accumulation."""
    return jnp.dot(a.astype(_MXU_DTYPE), b.astype(_MXU_DTYPE),
                   preferred_element_type=jnp.float32)


# -----------------------------------------------------------------------------
# Fused kernel: all DDGCN stages, one batch element per grid step.
# -----------------------------------------------------------------------------
def _final_stage_kernel(*refs, stage_meta, fin):
    x_ref, a_ref = refs[0], refs[1]
    out_ref = refs[-1]
    p_refs = refs[2:-1]

    x_cur = x_ref[0].astype(jnp.float32)              # (N, Fin)
    n = x_cur.shape[0]

    out_parts = []
    layer = 0                                         # cursor into stacked atts
    pr = 0                                            # cursor into param refs

    # TODO(synk): BatchNorm running stats / learned affine and train-mode
    # dropout are not modeled (eval-mode, default-init BN scale folded in W/b).
    for (num_block, has_aux, n_aux) in stage_meta:
        w_in, b_in = p_refs[pr], p_refs[pr + 1]; pr += 2
        if num_block > 0:
            w_blk, b_blk = p_refs[pr], p_refs[pr + 1]; pr += 2
        w_tail, b_tail = p_refs[pr], p_refs[pr + 1]; pr += 2

        # gc_in -> BN(folded) -> tanh
        a = a_ref[layer]; layer += 1
        h = jnp.tanh(_mm(a, _mm(x_cur, w_in[...])) + b_in[...])

        # residual GC blocks
        for bi in range(num_block):
            r = h
            for j in range(2):
                a = a_ref[layer]; layer += 1
                h = jnp.tanh(_mm(a, _mm(h, w_blk[2 * bi + j]))
                             + b_blk[2 * bi + j])
            h = h + r

        # fused tail: one h @ [W_out | W_aux] push, one [A_out; A_aux] @ s push
        s = _mm(h, w_tail[...])                       # (N, Fin [+ n_aux])
        if has_aux:
            a_stack = jnp.concatenate(
                [a_ref[layer], a_ref[layer + 1]], axis=0)     # (2N, N)
            layer += 2
            y_both = _mm(a_stack, s) + b_tail[...]            # (2N, Fin+n_aux)
            y = y_both[:n, :fin] + x_cur                      # global residual
            aux = y_both[n:, fin:]
            out_parts.append(y)
            out_parts.append(aux)
        else:
            a = a_ref[layer]; layer += 1
            y = _mm(a, s) + b_tail[...] + x_cur
            out_parts.append(y)

        x_cur = y                                     # feeds next stage (vregs)

    out_ref[0] = jnp.concatenate(out_parts, axis=-1).astype(out_ref.dtype)


def _const_map(ndim):
    return lambda b: (0,) * ndim


# -----------------------------------------------------------------------------
# Wrapper: pack parameters, build specs, call the fused kernel, split outputs.
# -----------------------------------------------------------------------------
def final_stage_forward(params, gcn_types, x, pred_frame):
    """params: list of per-stage dicts; gcn_types/pred_frame are static."""
    B, N, Fin = x.shape
    dtype = x.dtype
    bn_scale = 1.0 / math.sqrt(1.0 + 1e-5)   # default-init BatchNorm1d, eval

    atts = []
    stage_inputs = []
    stage_meta = []
    col_layout = []                           # (output key, column width)

    for i, (p, gcn_type) in enumerate(zip(params, gcn_types)):
        has_aux = gcn_type == "int"
        num_block = len(p["blocks"])

        atts.append(p["gc_in"]["att"])
        stage_inputs += [p["gc_in"]["w"] * bn_scale,
                         p["gc_in"]["b"] * bn_scale]

        if num_block > 0:
            w_blk, b_blk = [], []
            for blk in p["blocks"]:
                for gc in (blk["gc_a"], blk["gc_b"]):
                    atts.append(gc["att"])
                    w_blk.append(gc["w"] * bn_scale)
                    b_blk.append(gc["b"] * bn_scale)
            stage_inputs += [jnp.stack(w_blk), jnp.stack(b_blk)]

        atts.append(p["gc_out"]["att"])
        w_tail, b_tail = p["gc_out"]["w"], p["gc_out"]["b"]
        n_aux = 0
        if has_aux:
            ga = p["gc_aux"]
            atts.append(ga["att"])
            pf = tuple(int(v) for v in pred_frame)      # static
            if pf == tuple(range(pf[0], pf[0] + len(pf))):
                w_aux = ga["w"][:, pf[0]:pf[0] + len(pf)]   # static slice
                b_aux = ga["b"][:, pf[0]:pf[0] + len(pf)]
            else:
                w_aux = ga["w"][:, list(pf)]
                b_aux = ga["b"][:, list(pf)]
            n_aux = len(pf)
            w_tail = jnp.concatenate([w_tail, w_aux], axis=1)
            b_tail = jnp.concatenate([b_tail, b_aux], axis=1)
        stage_inputs += [w_tail, b_tail]

        stage_meta.append((num_block, has_aux, n_aux))
        col_layout.append((f"y{i}", Fin))
        if has_aux:
            col_layout.append((f"aux_y{i}", n_aux))

    a_all = jnp.stack(atts)                   # (L_total, N, N), one DMA
    total_cols = sum(w for _, w in col_layout)

    inputs = [x, a_all] + stage_inputs
    in_specs = [pl.BlockSpec((1, N, Fin), lambda b: (b, 0, 0))]
    for arr in inputs[1:]:
        in_specs.append(pl.BlockSpec(arr.shape, _const_map(arr.ndim)))
    out_specs = pl.BlockSpec((1, N, total_cols), lambda b: (b, 0, 0))

    kernel = functools.partial(_final_stage_kernel,
                               stage_meta=tuple(stage_meta), fin=Fin)
    out = pl.pallas_call(
        kernel,
        out_shape=jax.ShapeDtypeStruct((B, N, total_cols), dtype),
        grid_spec=pltpu.PrefetchScalarGridSpec(
            num_scalar_prefetch=0,
            grid=(B,),
            in_specs=in_specs,
            out_specs=out_specs,
        ),
        compiler_params=pltpu.CompilerParams(
            dimension_semantics=("parallel",)),
    )(*inputs)

    output_dict = {}
    c = 0
    for key, w in col_layout:
        output_dict[key] = out[:, :, c:c + w]
        c += w
    return output_dict


# -----------------------------------------------------------------------------
# Parameter construction (deterministic, PyTorch-style uniform init)
# -----------------------------------------------------------------------------
def _init_gc(key, node_n, fin, fout):
    k1, k2, k3 = jax.random.split(key, 3)
    stdv = 1.0 / jnp.sqrt(jnp.float32(fout))
    return {
        "att": jax.random.uniform(k1, (node_n, node_n), jnp.float32, -stdv, stdv),
        "w": jax.random.uniform(k2, (fin, fout), jnp.float32, -stdv, stdv),
        "b": jax.random.uniform(k3, (1, fout), jnp.float32, -stdv, stdv),
    }


def _init_ddgcn(key, input_feature, hidden_feature, num_block, joint_n, is_inter):
    keys = jax.random.split(key, 3 + 2 * num_block + (1 if is_inter else 0))
    params = {
        "gc_in": _init_gc(keys[0], joint_n, input_feature, hidden_feature),
        "blocks": [
            {
                "gc_a": _init_gc(keys[2 + 2 * i], joint_n, hidden_feature, hidden_feature),
                "gc_b": _init_gc(keys[3 + 2 * i], joint_n, hidden_feature, hidden_feature),
            }
            for i in range(num_block)
        ],
        "gc_out": _init_gc(keys[1], joint_n, hidden_feature, input_feature),
    }
    if is_inter:
        # TODO(synk): model_inter.DDGCN source unavailable; aux head modelled as
        # an extra graph conv with pred_frame feature columns selected.
        params["gc_aux"] = _init_gc(keys[-1], joint_n, hidden_feature, input_feature)
    return params


def init_final_stage(key, input_feature, num_hids, num_blocks, joint_n, gcn_types):
    keys = jax.random.split(key, len(gcn_types))
    return [
        _init_ddgcn(k, input_feature, h, nb, joint_n, gcn_type == "int")
        for k, h, nb, gcn_type in zip(keys, num_hids, num_blocks, gcn_types)
    ]


# -----------------------------------------------------------------------------
if __name__ == "__main__":
    B = 2
    input_feature = 8        # per-node feature dim (e.g. DCT coeffs / frames)
    joint_n = 16             # graph nodes
    frame_n = 16             # unused by this simplified stage
    num_hids = (32, 32)
    num_blocks = (1, 1)
    gcn_types = ("van", "int")
    num_pred_frame = 4

    key = jax.random.PRNGKey(0)
    k_param, k_x = jax.random.split(key)
    params = init_final_stage(k_param, input_feature, num_hids, num_blocks,
                              joint_n, gcn_types)

    x = jax.random.normal(k_x, (B, joint_n, input_feature), jnp.float32)
    # pred_frame is static (compile-time); folded into the aux weight columns.
    pred_frame = tuple(range(input_feature - num_pred_frame, input_feature))

    fwd = jax.jit(final_stage_forward, static_argnums=(1, 3))
    out = fwd(params, gcn_types, x, pred_frame)
    jax.block_until_ready(out)

    assert out["y0"].shape == (B, joint_n, input_feature)
    assert out["y1"].shape == (B, joint_n, input_feature)
    assert out["aux_y1"].shape == (B, joint_n, num_pred_frame)
    print("KERNEL_OK")
</pallas_src>

<mosaic_0001>
module attributes {stable_mosaic.version = 11 : i64} {
  func.func @_final_stage_kernel(%arg0: i32, %arg1: memref<1x16x8xf32, #tpu.memory_space<vmem>>, %arg2: memref<9x16x16xf32, #tpu.memory_space<vmem>>, %arg3: memref<8x32xf32, #tpu.memory_space<vmem>>, %arg4: memref<1x32xf32, #tpu.memory_space<vmem>>, %arg5: memref<2x32x32xf32, #tpu.memory_space<vmem>>, %arg6: memref<2x1x32xf32, #tpu.memory_space<vmem>>, %arg7: memref<32x8xf32, #tpu.memory_space<vmem>>, %arg8: memref<1x8xf32, #tpu.memory_space<vmem>>, %arg9: memref<8x32xf32, #tpu.memory_space<vmem>>, %arg10: memref<1x32xf32, #tpu.memory_space<vmem>>, %arg11: memref<2x32x32xf32, #tpu.memory_space<vmem>>, %arg12: memref<2x1x32xf32, #tpu.memory_space<vmem>>, %arg13: memref<32x12xf32, #tpu.memory_space<vmem>>, %arg14: memref<1x12xf32, #tpu.memory_space<vmem>>, %arg15: memref<1x16x20xf32, #tpu.memory_space<vmem>>) attributes {dimension_semantics = [#tpu.dimension_semantics<parallel>], iteration_bounds = array<i64: 2>, scalar_prefetch = 0 : i64, scratch_operands = 0 : i64, tpu.core_type = #tpu.core_type<tc>, window_params = [{transform_indices = @transform_0, window_bounds = array<i64: 1, 16, 8>}, {pipeline_mode = #tpu.pipeline_mode<synchronous>, transform_indices = @transform_1, window_bounds = array<i64: 9, 16, 16>}, {pipeline_mode = #tpu.pipeline_mode<synchronous>, transform_indices = @transform_2, window_bounds = array<i64: 8, 32>}, {pipeline_mode = #tpu.pipeline_mode<synchronous>, transform_indices = @transform_3, window_bounds = array<i64: 1, 32>}, {pipeline_mode = #tpu.pipeline_mode<synchronous>, transform_indices = @transform_4, window_bounds = array<i64: 2, 32, 32>}, {pipeline_mode = #tpu.pipeline_mode<synchronous>, transform_indices = @transform_5, window_bounds = array<i64: 2, 1, 32>}, {pipeline_mode = #tpu.pipeline_mode<synchronous>, transform_indices = @transform_6, window_bounds = array<i64: 32, 8>}, {pipeline_mode = #tpu.pipeline_mode<synchronous>, transform_indices = @transform_7, window_bounds = array<i64: 1, 8>}, {pipeline_mode = #tpu.pipeline_mode<synchronous>, transform_indices = @transform_8, window_bounds = array<i64: 8, 32>}, {pipeline_mode = #tpu.pipeline_mode<synchronous>, transform_indices = @transform_9, window_bounds = array<i64: 1, 32>}, {pipeline_mode = #tpu.pipeline_mode<synchronous>, transform_indices = @transform_10, window_bounds = array<i64: 2, 32, 32>}, {pipeline_mode = #tpu.pipeline_mode<synchronous>, transform_indices = @transform_11, window_bounds = array<i64: 2, 1, 32>}, {pipeline_mode = #tpu.pipeline_mode<synchronous>, transform_indices = @transform_12, window_bounds = array<i64: 32, 12>}, {pipeline_mode = #tpu.pipeline_mode<synchronous>, transform_indices = @transform_13, window_bounds = array<i64: 1, 12>}, {transform_indices = @transform_14, window_bounds = array<i64: 1, 16, 20>}]} {
    %c0 = arith.constant 0 : index
    %c0_0 = arith.constant 0 : index
    %c0_1 = arith.constant 0 : index
    %0 = vector.load %arg1[%c0, %c0_0, %c0_1] : memref<1x16x8xf32, #tpu.memory_space<vmem>>, vector<1x16x8xf32>
    %1 = vector.shape_cast %0 : vector<1x16x8xf32> to vector<16x8xf32>
    %c0_2 = arith.constant 0 : index
    %c0_3 = arith.constant 0 : index
    %c0_4 = arith.constant 0 : index
    %2 = vector.load %arg2[%c0_2, %c0_3, %c0_4] : memref<9x16x16xf32, #tpu.memory_space<vmem>>, vector<1x16x16xf32>
    %3 = vector.shape_cast %2 : vector<1x16x16xf32> to vector<16x16xf32>
    %c0_5 = arith.constant 0 : index
    %c0_6 = arith.constant 0 : index
    %4 = vector.load %arg3[%c0_5, %c0_6] : memref<8x32xf32, #tpu.memory_space<vmem>>, vector<8x32xf32>
    %cst = arith.constant dense<0.000000e+00> : vector<16x32xf32>
    %5 = tpu.matmul %1, %4, %cst {dimension_numbers = #tpu.dot_dimension_numbers<[1], [0], [0], [1], [0, 0, 1, 1], [], []>} : vector<16x8xf32>, vector<8x32xf32>, vector<16x32xf32> -> vector<16x32xf32>
    %cst_7 = arith.constant dense<0.000000e+00> : vector<16x32xf32>
    %6 = tpu.matmul %3, %5, %cst_7 {dimension_numbers = #tpu.dot_dimension_numbers<[1], [0], [0], [1], [0, 0, 1, 1], [], []>} : vector<16x16xf32>, vector<16x32xf32>, vector<16x32xf32> -> vector<16x32xf32>
    %c0_8 = arith.constant 0 : index
    %c0_9 = arith.constant 0 : index
    %7 = vector.load %arg4[%c0_8, %c0_9] : memref<1x32xf32, #tpu.memory_space<vmem>>, vector<1x32xf32>
    %8 = vector.broadcast %7 : vector<1x32xf32> to vector<16x32xf32>
    %9 = arith.addf %6, %8 : vector<16x32xf32>
    %10 = math.tanh %9 : vector<16x32xf32>
    %c1 = arith.constant 1 : index
    %c0_10 = arith.constant 0 : index
    %c0_11 = arith.constant 0 : index
    %11 = vector.load %arg2[%c1, %c0_10, %c0_11] : memref<9x16x16xf32, #tpu.memory_space<vmem>>, vector<1x16x16xf32>
    %12 = vector.shape_cast %11 : vector<1x16x16xf32> to vector<16x16xf32>
    %c0_12 = arith.constant 0 : index
    %c0_13 = arith.constant 0 : index
    %c0_14 = arith.constant 0 : index
    %13 = vector.load %arg5[%c0_12, %c0_13, %c0_14] : memref<2x32x32xf32, #tpu.memory_space<vmem>>, vector<1x32x32xf32>
    %14 = vector.shape_cast %13 : vector<1x32x32xf32> to vector<32x32xf32>
    %cst_15 = arith.constant dense<0.000000e+00> : vector<16x32xf32>
    %15 = tpu.matmul %10, %14, %cst_15 {dimension_numbers = #tpu.dot_dimension_numbers<[1], [0], [0], [1], [0, 0, 1, 1], [], []>} : vector<16x32xf32>, vector<32x32xf32>, vector<16x32xf32> -> vector<16x32xf32>
    %cst_16 = arith.constant dense<0.000000e+00> : vector<16x32xf32>
    %16 = tpu.matmul %12, %15, %cst_16 {dimension_numbers = #tpu.dot_dimension_numbers<[1], [0], [0], [1], [0, 0, 1, 1], [], []>} : vector<16x16xf32>, vector<16x32xf32>, vector<16x32xf32> -> vector<16x32xf32>
    %c0_17 = arith.constant 0 : index
    %c0_18 = arith.constant 0 : index
    %c0_19 = arith.constant 0 : index
    %17 = vector.load %arg6[%c0_17, %c0_18, %c0_19] : memref<2x1x32xf32, #tpu.memory_space<vmem>>, vector<1x1x32xf32>
    %18 = vector.shape_cast %17 : vector<1x1x32xf32> to vector<1x32xf32>
    %19 = vector.broadcast %18 : vector<1x32xf32> to vector<16x32xf32>
    %20 = arith.addf %16, %19 : vector<16x32xf32>
    %21 = math.tanh %20 : vector<16x32xf32>
    %c2 = arith.constant 2 : index
    %c0_20 = arith.constant 0 : index
    %c0_21 = arith.constant 0 : index
    %22 = vector.load %arg2[%c2, %c0_20, %c0_21] : memref<9x16x16xf32, #tpu.memory_space<vmem>>, vector<1x16x16xf32>
    %23 = vector.shape_cast %22 : vector<1x16x16xf32> to vector<16x16xf32>
    %c1_22 = arith.constant 1 : index
    %c0_23 = arith.constant 0 : index
    %c0_24 = arith.constant 0 : index
    %24 = vector.load %arg5[%c1_22, %c0_23, %c0_24] : memref<2x32x32xf32, #tpu.memory_space<vmem>>, vector<1x32x32xf32>
    %25 = vector.shape_cast %24 : vector<1x32x32xf32> to vector<32x32xf32>
    %cst_25 = arith.constant dense<0.000000e+00> : vector<16x32xf32>
    %26 = tpu.matmul %21, %25, %cst_25 {dimension_numbers = #tpu.dot_dimension_numbers<[1], [0], [0], [1], [0, 0, 1, 1], [], []>} : vector<16x32xf32>, vector<32x32xf32>, vector<16x32xf32> -> vector<16x32xf32>
    %cst_26 = arith.constant dense<0.000000e+00> : vector<16x32xf32>
    %27 = tpu.matmul %23, %26, %cst_26 {dimension_numbers = #tpu.dot_dimension_numbers<[1], [0], [0], [1], [0, 0, 1, 1], [], []>} : vector<16x16xf32>, vector<16x32xf32>, vector<16x32xf32> -> vector<16x32xf32>
    %c1_27 = arith.constant 1 : index
    %c0_28 = arith.constant 0 : index
    %c0_29 = arith.constant 0 : index
    %28 = vector.load %arg6[%c1_27, %c0_28, %c0_29] : memref<2x1x32xf32, #tpu.memory_space<vmem>>, vector<1x1x32xf32>
    %29 = vector.shape_cast %28 : vector<1x1x32xf32> to vector<1x32xf32>
    %30 = vector.broadcast %29 : vector<1x32xf32> to vector<16x32xf32>
    %31 = arith.addf %27, %30 : vector<16x32xf32>
    %32 = math.tanh %31 : vector<16x32xf32>
    %33 = arith.addf %32, %10 : vector<16x32xf32>
    %c0_30 = arith.constant 0 : index
    %c0_31 = arith.constant 0 : index
    %34 = vector.load %arg7[%c0_30, %c0_31] : memref<32x8xf32, #tpu.memory_space<vmem>>, vector<32x8xf32>
    %cst_32 = arith.constant dense<0.000000e+00> : vector<16x8xf32>
    %35 = tpu.matmul %33, %34, %cst_32 {dimension_numbers = #tpu.dot_dimension_numbers<[1], [0], [0], [1], [0, 0, 1, 1], [], []>} : vector<16x32xf32>, vector<32x8xf32>, vector<16x8xf32> -> vector<16x8xf32>
    %c3 = arith.constant 3 : index
    %c0_33 = arith.constant 0 : index
    %c0_34 = arith.constant 0 : index
    %36 = vector.load %arg2[%c3, %c0_33, %c0_34] : memref<9x16x16xf32, #tpu.memory_space<vmem>>, vector<1x16x16xf32>
    %37 = vector.shape_cast %36 : vector<1x16x16xf32> to vector<16x16xf32>
    %cst_35 = arith.constant dense<0.000000e+00> : vector<16x8xf32>
    %38 = tpu.matmul %37, %35, %cst_35 {dimension_numbers = #tpu.dot_dimension_numbers<[1], [0], [0], [1], [0, 0, 1, 1], [], []>} : vector<16x16xf32>, vector<16x8xf32>, vector<16x8xf32> -> vector<16x8xf32>
    %c0_36 = arith.constant 0 : index
    %c0_37 = arith.constant 0 : index
    %39 = vector.load %arg8[%c0_36, %c0_37] : memref<1x8xf32, #tpu.memory_space<vmem>>, vector<1x8xf32>
    %40 = vector.broadcast %39 : vector<1x8xf32> to vector<16x8xf32>
    %41 = arith.addf %38, %40 : vector<16x8xf32>
    %42 = arith.addf %41, %1 : vector<16x8xf32>
    %c4 = arith.constant 4 : index
    %c0_38 = arith.constant 0 : index
    %c0_39 = arith.constant 0 : index
    %43 = vector.load %arg2[%c4, %c0_38, %c0_39] : memref<9x16x16xf32, #tpu.memory_space<vmem>>, vector<1x16x16xf32>
    %44 = vector.shape_cast %43 : vector<1x16x16xf32> to vector<16x16xf32>
    %c0_40 = arith.constant 0 : index
    %c0_41 = arith.constant 0 : index
    %45 = vector.load %arg9[%c0_40, %c0_41] : memref<8x32xf32, #tpu.memory_space<vmem>>, vector<8x32xf32>
    %cst_42 = arith.constant dense<0.000000e+00> : vector<16x32xf32>
    %46 = tpu.matmul %42, %45, %cst_42 {dimension_numbers = #tpu.dot_dimension_numbers<[1], [0], [0], [1], [0, 0, 1, 1], [], []>} : vector<16x8xf32>, vector<8x32xf32>, vector<16x32xf32> -> vector<16x32xf32>
    %cst_43 = arith.constant dense<0.000000e+00> : vector<16x32xf32>
    %47 = tpu.matmul %44, %46, %cst_43 {dimension_numbers = #tpu.dot_dimension_numbers<[1], [0], [0], [1], [0, 0, 1, 1], [], []>} : vector<16x16xf32>, vector<16x32xf32>, vector<16x32xf32> -> vector<16x32xf32>
    %c0_44 = arith.constant 0 : index
    %c0_45 = arith.constant 0 : index
    %48 = vector.load %arg10[%c0_44, %c0_45] : memref<1x32xf32, #tpu.memory_space<vmem>>, vector<1x32xf32>
    %49 = vector.broadcast %48 : vector<1x32xf32> to vector<16x32xf32>
    %50 = arith.addf %47, %49 : vector<16x32xf32>
    %51 = math.tanh %50 : vector<16x32xf32>
    %c5 = arith.constant 5 : index
    %c0_46 = arith.constant 0 : index
    %c0_47 = arith.constant 0 : index
    %52 = vector.load %arg2[%c5, %c0_46, %c0_47] : memref<9x16x16xf32, #tpu.memory_space<vmem>>, vector<1x16x16xf32>
    %53 = vector.shape_cast %52 : vector<1x16x16xf32> to vector<16x16xf32>
    %c0_48 = arith.constant 0 : index
    %c0_49 = arith.constant 0 : index
    %c0_50 = arith.constant 0 : index
    %54 = vector.load %arg11[%c0_48, %c0_49, %c0_50] : memref<2x32x32xf32, #tpu.memory_space<vmem>>, vector<1x32x32xf32>
    %55 = vector.shape_cast %54 : vector<1x32x32xf32> to vector<32x32xf32>
    %cst_51 = arith.constant dense<0.000000e+00> : vector<16x32xf32>
    %56 = tpu.matmul %51, %55, %cst_51 {dimension_numbers = #tpu.dot_dimension_numbers<[1], [0], [0], [1], [0, 0, 1, 1], [], []>} : vector<16x32xf32>, vector<32x32xf32>, vector<16x32xf32> -> vector<16x32xf32>
    %cst_52 = arith.constant dense<0.000000e+00> : vector<16x32xf32>
    %57 = tpu.matmul %53, %56, %cst_52 {dimension_numbers = #tpu.dot_dimension_numbers<[1], [0], [0], [1], [0, 0, 1, 1], [], []>} : vector<16x16xf32>, vector<16x32xf32>, vector<16x32xf32> -> vector<16x32xf32>
    %c0_53 = arith.constant 0 : index
    %c0_54 = arith.constant 0 : index
    %c0_55 = arith.constant 0 : index
    %58 = vector.load %arg12[%c0_53, %c0_54, %c0_55] : memref<2x1x32xf32, #tpu.memory_space<vmem>>, vector<1x1x32xf32>
    %59 = vector.shape_cast %58 : vector<1x1x32xf32> to vector<1x32xf32>
    %60 = vector.broadcast %59 : vector<1x32xf32> to vector<16x32xf32>
    %61 = arith.addf %57, %60 : vector<16x32xf32>
    %62 = math.tanh %61 : vector<16x32xf32>
    %c6 = arith.constant 6 : index
    %c0_56 = arith.constant 0 : index
    %c0_57 = arith.constant 0 : index
    %63 = vector.load %arg2[%c6, %c0_56, %c0_57] : memref<9x16x16xf32, #tpu.memory_space<vmem>>, vector<1x16x16xf32>
    %64 = vector.shape_cast %63 : vector<1x16x16xf32> to vector<16x16xf32>
    %c1_58 = arith.constant 1 : index
    %c0_59 = arith.constant 0 : index
    %c0_60 = arith.constant 0 : index
    %65 = vector.load %arg11[%c1_58, %c0_59, %c0_60] : memref<2x32x32xf32, #tpu.memory_space<vmem>>, vector<1x32x32xf32>
    %66 = vector.shape_cast %65 : vector<1x32x32xf32> to vector<32x32xf32>
    %cst_61 = arith.constant dense<0.000000e+00> : vector<16x32xf32>
    %67 = tpu.matmul %62, %66, %cst_61 {dimension_numbers = #tpu.dot_dimension_numbers<[1], [0], [0], [1], [0, 0, 1, 1], [], []>} : vector<16x32xf32>, vector<32x32xf32>, vector<16x32xf32> -> vector<16x32xf32>
    %cst_62 = arith.constant dense<0.000000e+00> : vector<16x32xf32>
    %68 = tpu.matmul %64, %67, %cst_62 {dimension_numbers = #tpu.dot_dimension_numbers<[1], [0], [0], [1], [0, 0, 1, 1], [], []>} : vector<16x16xf32>, vector<16x32xf32>, vector<16x32xf32> -> vector<16x32xf32>
    %c1_63 = arith.constant 1 : index
    %c0_64 = arith.constant 0 : index
    %c0_65 = arith.constant 0 : index
    %69 = vector.load %arg12[%c1_63, %c0_64, %c0_65] : memref<2x1x32xf32, #tpu.memory_space<vmem>>, vector<1x1x32xf32>
    %70 = vector.shape_cast %69 : vector<1x1x32xf32> to vector<1x32xf32>
    %71 = vector.broadcast %70 : vector<1x32xf32> to vector<16x32xf32>
    %72 = arith.addf %68, %71 : vector<16x32xf32>
    %73 = math.tanh %72 : vector<16x32xf32>
    %74 = arith.addf %73, %51 : vector<16x32xf32>
    %c0_66 = arith.constant 0 : index
    %c0_67 = arith.constant 0 : index
    %75 = vector.load %arg13[%c0_66, %c0_67] : memref<32x12xf32, #tpu.memory_space<vmem>>, vector<32x12xf32>
    %cst_68 = arith.constant dense<0.000000e+00> : vector<16x12xf32>
    %76 = tpu.matmul %74, %75, %cst_68 {dimension_numbers = #tpu.dot_dimension_numbers<[1], [0], [0], [1], [0, 0, 1, 1], [], []>} : vector<16x32xf32>, vector<32x12xf32>, vector<16x12xf32> -> vector<16x12xf32>
    %c7 = arith.constant 7 : index
    %c0_69 = arith.constant 0 : index
    %c0_70 = arith.constant 0 : index
    %77 = vector.load %arg2[%c7, %c0_69, %c0_70] : memref<9x16x16xf32, #tpu.memory_space<vmem>>, vector<1x16x16xf32>
    %78 = vector.shape_cast %77 : vector<1x16x16xf32> to vector<16x16xf32>
    %c8 = arith.constant 8 : index
    %c0_71 = arith.constant 0 : index
    %c0_72 = arith.constant 0 : index
    %79 = vector.load %arg2[%c8, %c0_71, %c0_72] : memref<9x16x16xf32, #tpu.memory_space<vmem>>, vector<1x16x16xf32>
    %80 = vector.shape_cast %79 : vector<1x16x16xf32> to vector<16x16xf32>
    %81 = tpu.concatenate %78, %80 in 0 : vector<16x16xf32>, vector<16x16xf32> -> vector<32x16xf32>
    %cst_73 = arith.constant dense<0.000000e+00> : vector<32x12xf32>
    %82 = tpu.matmul %81, %76, %cst_73 {dimension_numbers = #tpu.dot_dimension_numbers<[1], [0], [0], [1], [0, 0, 1, 1], [], []>} : vector<32x16xf32>, vector<16x12xf32>, vector<32x12xf32> -> vector<32x12xf32>
    %c0_74 = arith.constant 0 : index
    %c0_75 = arith.constant 0 : index
    %83 = vector.load %arg14[%c0_74, %c0_75] : memref<1x12xf32, #tpu.memory_space<vmem>>, vector<1x12xf32>
    %84 = vector.broadcast %83 : vector<1x12xf32> to vector<32x12xf32>
    %85 = arith.addf %82, %84 : vector<32x12xf32>
    %86 = vector.extract_strided_slice %85 {offsets = [0, 0], sizes = [16, 8], strides = [1, 1]} : vector<32x12xf32> to vector<16x8xf32>
    %87 = arith.addf %86, %42 : vector<16x8xf32>
    %88 = vector.extract_strided_slice %85 {offsets = [16, 8], sizes = [16, 4], strides = [1, 1]} : vector<32x12xf32> to vector<16x4xf32>
    %89 = tpu.concatenate %42, %87, %88 in 1 : vector<16x8xf32>, vector<16x8xf32>, vector<16x4xf32> -> vector<16x20xf32>
    %c0_76 = arith.constant 0 : index
    %c0_77 = arith.constant 0 : index
    %c0_78 = arith.constant 0 : index
    %90 = vector.load %arg15[%c0_76, %c0_77, %c0_78] : memref<1x16x20xf32, #tpu.memory_space<vmem>>, vector<1x16x20xf32>
    %91 = vector.shape_cast %90 : vector<1x16x20xf32> to vector<16x20xf32>
    %92 = vector.shape_cast %89 : vector<16x20xf32> to vector<1x16x20xf32>
    tpu.vector_store %arg15[%c0_76, %c0_77, %c0_78], %92 {strides = array<i32>} : memref<1x16x20xf32, #tpu.memory_space<vmem>>, vector<1x16x20xf32>,
    return
  }
  func.func @transform_0(%arg0: i32) -> (i32, i32, i32) {
    %c0_i32 = arith.constant 0 : i32
    %c0_i32_0 = arith.constant 0 : i32
    %c0_i32_1 = arith.constant 0 : i32
    return %arg0, %c0_i32, %c0_i32_0 : i32, i32, i32
  }
  func.func @transform_1(%arg0: i32) -> (i32, i32, i32) {
    %c0_i32 = arith.constant 0 : i32
    %c0_i32_0 = arith.constant 0 : i32
    %c0_i32_1 = arith.constant 0 : i32
    %c0_i32_2 = arith.constant 0 : i32
    return %c0_i32, %c0_i32_0, %c0_i32_1 : i32, i32, i32
  }
  func.func @transform_2(%arg0: i32) -> (i32, i32) {
    %c0_i32 = arith.constant 0 : i32
    %c0_i32_0 = arith.constant 0 : i32
    %c0_i32_1 = arith.constant 0 : i32
    return %c0_i32, %c0_i32_0 : i32, i32
  }
  func.func @transform_3(%arg0: i32) -> (i32, i32) {
    %c0_i32 = arith.constant 0 : i32
    %c0_i32_0 = arith.constant 0 : i32
    %c0_i32_1 = arith.constant 0 : i32
    return %c0_i32, %c0_i32_0 : i32, i32
  }
  func.func @transform_4(%arg0: i32) -> (i32, i32, i32) {
    %c0_i32 = arith.constant 0 : i32
    %c0_i32_0 = arith.constant 0 : i32
    %c0_i32_1 = arith.constant 0 : i32
    %c0_i32_2 = arith.constant 0 : i32
    return %c0_i32, %c0_i32_0, %c0_i32_1 : i32, i32, i32
  }
  func.func @transform_5(%arg0: i32) -> (i32, i32, i32) {
    %c0_i32 = arith.constant 0 : i32
    %c0_i32_0 = arith.constant 0 : i32
    %c0_i32_1 = arith.constant 0 : i32
    %c0_i32_2 = arith.constant 0 : i32
    return %c0_i32, %c0_i32_0, %c0_i32_1 : i32, i32, i32
  }
  func.func @transform_6(%arg0: i32) -> (i32, i32) {
    %c0_i32 = arith.constant 0 : i32
    %c0_i32_0 = arith.constant 0 : i32
    %c0_i32_1 = arith.constant 0 : i32
    return %c0_i32, %c0_i32_0 : i32, i32
  }
  func.func @transform_7(%arg0: i32) -> (i32, i32) {
    %c0_i32 = arith.constant 0 : i32
    %c0_i32_0 = arith.constant 0 : i32
    %c0_i32_1 = arith.constant 0 : i32
    return %c0_i32, %c0_i32_0 : i32, i32
  }
  func.func @transform_8(%arg0: i32) -> (i32, i32) {
    %c0_i32 = arith.constant 0 : i32
    %c0_i32_0 = arith.constant 0 : i32
    %c0_i32_1 = arith.constant 0 : i32
    return %c0_i32, %c0_i32_0 : i32, i32
  }
  func.func @transform_9(%arg0: i32) -> (i32, i32) {
    %c0_i32 = arith.constant 0 : i32
    %c0_i32_0 = arith.constant 0 : i32
    %c0_i32_1 = arith.constant 0 : i32
    return %c0_i32, %c0_i32_0 : i32, i32
  }
  func.func @transform_10(%arg0: i32) -> (i32, i32, i32) {
    %c0_i32 = arith.constant 0 : i32
    %c0_i32_0 = arith.constant 0 : i32
    %c0_i32_1 = arith.constant 0 : i32
    %c0_i32_2 = arith.constant 0 : i32
    return %c0_i32, %c0_i32_0, %c0_i32_1 : i32, i32, i32
  }
  func.func @transform_11(%arg0: i32) -> (i32, i32, i32) {
    %c0_i32 = arith.constant 0 : i32
    %c0_i32_0 = arith.constant 0 : i32
    %c0_i32_1 = arith.constant 0 : i32
    %c0_i32_2 = arith.constant 0 : i32
    return %c0_i32, %c0_i32_0, %c0_i32_1 : i32, i32, i32
  }
  func.func @transform_12(%arg0: i32) -> (i32, i32) {
    %c0_i32 = arith.constant 0 : i32
    %c0_i32_0 = arith.constant 0 : i32
    %c0_i32_1 = arith.constant 0 : i32
    return %c0_i32, %c0_i32_0 : i32, i32
  }
  func.func @transform_13(%arg0: i32) -> (i32, i32) {
    %c0_i32 = arith.constant 0 : i32
    %c0_i32_0 = arith.constant 0 : i32
    %c0_i32_1 = arith.constant 0 : i32
    return %c0_i32, %c0_i32_0 : i32, i32
  }
  func.func @transform_14(%arg0: i32) -> (i32, i32, i32) {
    %c0_i32 = arith.constant 0 : i32
    %c0_i32_0 = arith.constant 0 : i32
    %c0_i32_1 = arith.constant 0 : i32
    return %arg0, %c0_i32, %c0_i32_0 : i32, i32, i32
  }
}

</mosaic_0001>

<bundles_post_ra>
// kernel: final_stage_forward.1
= control target key start
LH: loop header
LB: loop body
LE: loop exit
PB: predicated region body
PF: predicated region fallthrough
CT: control target
= control target key end

     0   :  { %s2484_s29 = smov 0   ;;  %s2720_s0 = inlined_call_operand.vmem [shape: f32[2,16,8], index: 0, kind: input, shape index: {}]   ;;  %s2721_s1 = inlined_call_operand.vmem [shape: f32[9,16,16], index: 1, kind: input, shape index: {}]   ;;  %s2722_s2 = inlined_call_operand.vmem [shape: f32[8,32], index: 2, kind: input, shape index: {}]   ;;  %s2723_s3 = inlined_call_operand.vmem [shape: f32[1,32], index: 3, kind: input, shape index: {}]   ;;  %s2724_s4 = inlined_call_operand.vmem [shape: f32[2,32,32], index: 4, kind: input, shape index: {}]   ;;  %s2725_s5 = inlined_call_operand.vmem [shape: f32[2,1,32], index: 5, kind: input, shape index: {}]   ;;  %s2726_s6 = inlined_call_operand.vmem [shape: f32[32,8], index: 6, kind: input, shape index: {}]   ;;  %s2727_s7 = inlined_call_operand.vmem [shape: f32[1,8], index: 7, kind: input, shape index: {}]   ;;  %s2728_s8 = inlined_call_operand.vmem [shape: f32[8,32], index: 8, kind: input, shape index: {}]   ;;  %s2729_s9 = inlined_call_operand.vmem [shape: f32[1,32], index: 9, kind: input, shape index: {}]   ;;  %s2730_s10 = inlined_call_operand.vmem [shape: f32[2,32,32], index: 10, kind: input, shape index: {}]   ;;  %s2731_s11 = inlined_call_operand.vmem [shape: f32[2,1,32], index: 11, kind: input, shape index: {}]   ;;  %s2732_s12 = inlined_call_operand.vmem [shape: f32[32,12], index: 12, kind: input, shape index: {}]   ;;  %s2733_s13 = inlined_call_operand.vmem [shape: f32[1,12], index: 13, kind: input, shape index: {}]   ;;  %s2734_s14 = inlined_call_operand.vmem [shape: f32[2,16,20], index: 14, kind: output, shape index: {}]  }
   0x1 LB: > { %s1995_s30 = sadd.s32 4294967295, %s2406_s29   ;;  %p1999_p0 = scmp.ge.s32.totalorder %s2406_s29, 1  ;;  %s2406_s29 = sphi %s2484_s29, %s24_s29  }
   0x2   : > { %p412_p1 = scmp.lt.s32.totalorder %s2406_s29, 3 }
   0x4   : > { %p413_p2 = pnand %p1999_p0, %p412_p1 }
   0x5   : > { %v472_v0 = vld [vmem:[%s2722_s2] sm:$0xff] (!%p413_p2)  ;;  %p458_p3 = scmp.lt.s32.totalorder (!%p413_p2), %s1995_s30, 1  ;;  %vm473_vm0 = vcmask (!%p413_p2), 64512   ;;  %vm562_vm1 = vcmask (!%p413_p2), 130048   ;;  %v471_v7 = vld [vmem:[%s2721_s1 + $0x8] sm:$0xff] (!%p413_p2)  ;;  %v651_v10 = vld [vmem:[%s2724_s4 + $0x10] sm:$0xff] (!%p413_p2) }
   0x6   : > { %416 = sbr.rel (%p413_p2) target bundleno = 3694 (0xe6e), region = 76  ;;  %2152 = vmatprep.subr.mxu0 (!%p413_p2), %v472_v0  ;;  %v470_v3 = vld [vmem:[%s2721_s1] sm:$0xff] (!%p413_p2)  ;;  %v650_v9 = vld [vmem:[%s2724_s4 + $0x8] sm:$0xff] (!%p413_p2)  ;;  %v652_v12 = vld [vmem:[%s2724_s4 + $0x18] sm:$0xff] (!%p413_p2)  ;;  %vm653_vm2 = vcmask (!%p413_p2), 261120   ;;  %s2408_s19 = smov (!%p413_p2), 8  }
   0x7   : > { %2153 = vmatpush3.msra.mxu0 (!%p413_p2), %v472_v0  ;;  %2161 = vmatprep.mubr.msk.f32.mxu1 (!%p413_p2), %vm562_vm1, %v470_v3  ;;  %v649_v8 = vld [vmem:[%s2724_s4] sm:$0xff] (!%p413_p2)  ;;  %v2295_v13 = vpack.c.bf16 (!%p413_p2), %v652_v12, %v651_v10  ;;  %v2009_v21 = vld [vmem:[%s2721_s1 + $0x10] sm:$0xff] (!%p413_p2)  ;;  %v2010_v25 = vld [vmem:[%s2721_s1 + $0x18] sm:$0xff] (!%p413_p2)  ;;  %vm1937_vm3 = vcmask (!%p413_p2), 162816  }
   0x8   : > { %v2291_v11 = vpack.c.bf16 (!%p413_p2), %v650_v9, %v649_v8  ;;  %v2006_v14 = vld [vmem:[%s2723_s3] ss:$0 sm:$0xff] (!%p413_p2)  ;;  %v2019_v27 = vld [vmem:[%s2724_s4 + $0x28] sm:$0xff] (!%p413_p2)  ;;  %v2020_v28 = vld [vmem:[%s2724_s4 + $0x30] sm:$0xff] (!%p413_p2) }
   0x9   : > { %v2018_v26 = vld [vmem:[%s2724_s4 + $0x20] sm:$0xff] (!%p413_p2)  ;;  %v2021_v30 = vld [vmem:[%s2724_s4 + $0x38] sm:$0xff] (!%p413_p2)  ;;  %v2017_v43 = vld [vmem:[%s2721_s1 + $0x28] sm:$0xff] (!%p413_p2) }
   0xa   : > { %2292 = vmatprep.subr.bf16.mxu0 (!%p413_p2), %v2291_v11  ;;  %v2303_v29 = vpack.c.bf16 (!%p413_p2), %v2019_v27, %v2018_v26  ;;  %v2307_v31 = vpack.c.bf16 (!%p413_p2), %v2021_v30, %v2020_v28  ;;  %v2013_v32 = vld [vmem:[%s2725_s5] ss:$0 sm:$0xff] (!%p413_p2)  ;;  %v1008_v45 = vld [vmem:[%s2726_s6 + $0x8] sm:$0xff] (!%p413_p2)  ;;  %v1009_v46 = vld [vmem:[%s2726_s6 + $0x10] sm:$0xff] (!%p413_p2) }
   0xb   : > { %v2016_v39 = vld [vmem:[%s2721_s1 + $0x20] sm:$0xff] (!%p413_p2)  ;;  %v1010_v48 = vld [vmem:[%s2726_s6 + $0x18] sm:$0xff] (!%p413_p2)  ;;  %v2030_v59 = vld [vmem:[%s2721_s1 + $0x30] sm:$0xff] (!%p413_p2) }
   0xc   : > { %v1007_v44 = vld [vmem:[%s2726_s6] sm:$0xff] (!%p413_p2)  ;;  %v2319_v49 = vpack.c.bf16 (!%p413_p2), %v1010_v48, %v1009_v46  ;;  %v2031_v63 = vld [vmem:[%s2721_s1 + $0x38] sm:$0xff] (!%p413_p2)  ;;  %v2042_v26 = vld [vmem:[%s2721_s1 + $0x50] sm:$0xff] (!%p413_p2) }
   0xd   : > { %s2736_s30 = smov (!%p458_p3, %s1995_s30), 1  ;;  %v2315_v47 = vpack.c.bf16 %v1008_v45, %v1007_v44  ;;  %v2025_v50 = vld [vmem:[%s2725_s5 + $0x1] ss:$0 sm:$0xff]  ;;  %v2032_v3 = vld [vmem:[%s2727_s7] ss:$0 sm:$0xff]  ;;  %v2043_v30 = vld [vmem:[%s2721_s1 + $0x58] sm:$0xff] }
   0xe   : > { %s2074_s17 = sshll.u32 %s2736_s30, 4  ;;  %v1188_v0 = vld [vmem:[%s2728_s8] sm:$0xff]  ;;  %v2050_v48 = vld [vmem:[%s2721_s1 + $0x68] sm:$0xff] }
   0xf   : > { %s462_s20 = scalar_lea.vmem %s2720_s0, %s2074_s17  ;;  %v2035_v10 = vld [vmem:[%s2721_s1 + $0x40] sm:$0xff]  ;;  %s467_s22 = scalar_lea.vmem %s2734_s14, %s2074_s17 }
  0x10   : > { %v2503_v1 = vld [vmem:[%s462_s20] sm:$0xff]  ;;  %v2505_v2 = vld [vmem:[%s462_s20 + $0x8] sm:$0xff] }
  0x11   : > { %2154 = vmatprep.mubr.msk.f32.mxu0 %vm473_vm0, %v2503_v1  ;;  %v2049_v44 = vld [vmem:[%s2721_s1 + $0x60] sm:$0xff] }
  0x12   : > { %2155 = vmatmul.mubr.msk.f32.vlgmr.msra.gmra.mrb[0].mxu0 %vm473_vm0, %v2505_v2 }
  0x13   : > { %2294 = vmatpush3.bf16.msra.mxu0 %v2291_v11 }
  0x14   : > { %2296 = vmatprep.subr.bf16.mxu0 %v2295_v13 }
  0x17   : > { %2298 = vmatpush3.bf16.msra.mxu0 %v2295_v13 }
  0xe5   : > { %v2156_v4 = vpop.f32.mrb[0].mxu0 }
  0xe6   : > { %v546_v5 = vpop.f32.mrb[1].mxu0 }
  0xe7   : > { %v2287_v6 = vpack.c.bf16 %v2156_v4, %v546_v5 }
  0xe9   : > { %2288 = vmatprep.subr.bf16.mxu1 %v2287_v6 }
  0xea   : > { %2290 = vmatpush3.bf16.msra.mxu1 %v2287_v6 }
  0xed   : > { %2162 = vmatmul.mubr.msk.f32.vlgmr.msra.gmra.mrb[0].mxu1 %vm562_vm1, %v471_v7 }
  0xee   : > { %2179 = vmatprep.mubr.msk.f32.mxu1 %vm562_vm1, %v2009_v21 }
 0x1c0   : > { %v2163_v15 = vpop.f32.mrb[0].mxu1 }
 0x1c1   : > { %v641_v16 = vadd.f32 %v2163_v15, %v2006_v14  ;;  %v635_v17 = vpop.f32.mrb[1].mxu1  ;;  %v1365_v15 = vld [vmem:[%s2730_s10 + $0x10] sm:$0xff] }
 0x1c2   : > { %v636_v18 = vadd.f32 %v2006_v14, %v635_v17  ;;  %v1364_v14 = vld [vmem:[%s2730_s10 + $0x8] sm:$0xff]  ;;  %v1366_v17 = vld [vmem:[%s2730_s10 + $0x18] sm:$0xff] }
 0x1c4   : > { %2376 = vtanh.f32 %v636_v18  ;;  %v2335_v18 = vpack.c.bf16 %v1366_v17, %v1365_v15 }
 0x1c5   : > { %2378 = vtanh.f32 %v641_v16 }
 0x1ce   : > { %v2377_v19 = vpop.eup %2376 }
 0x1cf   : > { %v2379_v20 = vpop.eup %2378  ;;  %2172 = vmatprep.mubr.msk.f32.mxu0 %vm653_vm2, %v2377_v19 }
 0x1d0   : > { %2173 = vmatmul.mubr.msk.f32.vlgmr.msra.gmra.mrb[2].mxu0 %vm653_vm2, %v2379_v20 }
 0x1d1   : > { %2197 = vmatprep.mubr.msk.f32.mxu0 %vm562_vm1, %v2016_v39 }
 0x2a3   : > { %v2174_v22 = vpop.f32.mrb[2].mxu0 }
 0x2a4   : > { %v726_v23 = vpop.f32.mrb[3].mxu0 }
 0x2a5   : > { %v2299_v24 = vpack.c.bf16 %v2174_v22, %v726_v23 }
 0x2a7   : > { %2300 = vmatprep.subr.bf16.mxu1 %v2299_v24 }
 0x2a8   : > { %2302 = vmatpush3.bf16.msra.mxu1 %v2299_v24 }
 0x2a9   : > { %2304 = vmatprep.subr.bf16.mxu1 %v2303_v29 }
 0x2ab   : > { %2180 = vmatmul.mubr.msk.f32.vlgmr.msra.gmra.mrb[2].mxu1 %vm562_vm1, %v2010_v25 }
 0x2ac   : > { %2306 = vmatpush3.bf16.msra.mxu1 %v2303_v29 }
 0x2ad   : > { %2308 = vmatprep.subr.bf16.mxu1 %v2307_v31 }
 0x2b0   : > { %2310 = vmatpush3.bf16.msra.mxu1 %v2307_v31  ;;  %v2051_v31 = vld [vmem:[%s2730_s10 + $0x20] sm:$0xff] }
 0x37e   : > { %v2181_v33 = vpop.f32.mrb[2].mxu1 }
 0x37f   : > { %v820_v34 = vadd.f32 %v2181_v33, %v2013_v32  ;;  %v814_v35 = vpop.f32.mrb[3].mxu1  ;;  %v2053_v33 = vld [vmem:[%s2730_s10 + $0x30] sm:$0xff] }
 0x380   : > { %v815_v36 = vadd.f32 %v2013_v32, %v814_v35  ;;  %v2052_v32 = vld [vmem:[%s2730_s10 + $0x28] sm:$0xff]  ;;  %v2054_v35 = vld [vmem:[%s2730_s10 + $0x38] sm:$0xff] }
 0x382   : > { %2380 = vtanh.f32 %v815_v36  ;;  %v2347_v36 = vpack.c.bf16 %v2054_v35, %v2053_v33 }
 0x383   : > { %2382 = vtanh.f32 %v820_v34  ;;  %v2343_v34 = vpack.c.bf16 %v2052_v32, %v2051_v31 }
 0x38c   : > { %v2381_v37 = vpop.eup %2380 }
 0x38d   : > { %v2383_v38 = vpop.eup %2382  ;;  %2190 = vmatprep.mubr.msk.f32.mxu1 %vm653_vm2, %v2381_v37  ;;  %v2046_v37 = vld [vmem:[%s2731_s11] ss:$0 sm:$0xff] }
 0x38e   : > { %2191 = vmatmul.mubr.msk.f32.vlgmr.msra.gmra.mrb[4].mxu1 %vm653_vm2, %v2383_v38 }
 0x38f   : > { %2215 = vmatprep.mubr.msk.f32.mxu1 %vm562_vm1, %v2030_v59 }
 0x461   : > { %v2192_v40 = vpop.f32.mrb[4].mxu1 }
 0x462   : > { %v905_v41 = vpop.f32.mrb[5].mxu1 }
 0x463   : > { %v2311_v42 = vpack.c.bf16 %v2192_v40, %v905_v41 }
 0x465   : > { %2312 = vmatprep.subr.bf16.mxu0 %v2311_v42 }
 0x466   : > { %2314 = vmatpush3.bf16.msra.mxu0 %v2311_v42 }
 0x467   : > { %2316 = vmatprep.subr.bf16.mxu0 %v2315_v47 }
 0x469   : > { %2198 = vmatmul.mubr.msk.f32.vlgmr.msra.gmra.mrb[4].mxu0 %vm562_vm1, %v2017_v43 }
 0x46a   : > { %2318 = vmatpush3.bf16.msra.mxu0 %v2315_v47 }
 0x46b   : > { %2320 = vmatprep.subr.bf16.mxu0 %v2319_v49 }
 0x46e   : > { %2322 = vmatpush3.bf16.msra.mxu0 %v2319_v49  ;;  %v1720_v49 = vld [vmem:[%s2732_s12] sm:$0xff] }
 0x53c   : > { %v2199_v51 = vpop.f32.mrb[4].mxu0 }
 0x53d   : > { %v1000_v52 = vadd.f32 %v2199_v51, %v2025_v50  ;;  %v994_v53 = vpop.f32.mrb[5].mxu0  ;;  %v1722_v51 = vld [vmem:[%s2732_s12 + $0x10] sm:$0xff] }
 0x53e   : > { %v995_v54 = vadd.f32 %v2025_v50, %v994_v53  ;;  %v1721_v50 = vld [vmem:[%s2732_s12 + $0x8] sm:$0xff]  ;;  %v1723_v53 = vld [vmem:[%s2732_s12 + $0x18] sm:$0xff] }
 0x53f   : > { %2384 = vtanh.f32 %v1000_v52  ;;  %v2355_v52 = vpack.c.bf16 %v1721_v50, %v1720_v49 }
 0x540   : > { %2386 = vtanh.f32 %v995_v54  ;;  %v2359_v54 = vpack.c.bf16 %v1723_v53, %v1722_v51 }
 0x549   : > { %v2385_v55 = vpop.eup %2384 }
 0x54a   : > { %v2387_v56 = vpop.eup %2386  ;;  %v1006_v58 = vadd.f32 %v2385_v55, %v2379_v20  ;;  %v2058_v55 = vld [vmem:[%s2731_s11 + $0x1] ss:$0 sm:$0xff] }
 0x54b   : > { %v1005_v57 = vadd.f32 %v2387_v56, %v2377_v19  ;;  %v2039_v19 = vld [vmem:[%s2729_s9] ss:$0 sm:$0xff] }
 0x54d   : > { %2208 = vmatprep.mubr.msk.f32.mxu0 %vm653_vm2, %v1005_v57 }
 0x54e   : > { %2209 = vmatmul.mubr.msk.f32.vlgmr.msra.gmra.mrb[6].mxu0 %vm653_vm2, %v1006_v58 }
 0x54f   : > { %2227 = vmatprep.mubr.msk.f32.mxu0 %vm562_vm1, %v2035_v10  ;;  %v2066_v10 = vld [vmem:[%s2721_s1 + $0x88] sm:$0xff] }
 0x621   : > { %v2210_v60 = vpop.f32.mrb[6].mxu0 }
 0x622   : > { %v1083_v61 = vpop.f32.mrb[7].mxu0 }
 0x623   : > { %v2323_v62 = vpack.c.bf16 %v2210_v60, %v1083_v61 }
 0x625   : > { %2324 = vmatprep.subr.bf16.mxu1 %v2323_v62 }
 0x626   : > { %2326 = vmatpush3.bf16.msra.mxu1 %v2323_v62 }
 0x627   : > { %2218 = vmatprep.subr.mxu1 %v1188_v0 }
 0x629   : > { %2216 = vmatmul.mubr.msk.f32.vlgmr.msra.gmra.mrb[6].mxu1 %vm562_vm1, %v2031_v63 }
 0x62a   : > { %2219 = vmatpush3.msra.mxu1 %v1188_v0  ;;  %v2063_v0 = vld [vmem:[%s2721_s1 + $0x70] sm:$0xff] }
 0x6fc   : > { %v2217_v4 = vpop.f32.mrb[6].mxu1 }
 0x6fd   : > { %v1180_v5 = vadd.f32 %v2217_v4, %v2032_v3  ;;  %v1174_v6 = vpop.f32.mrb[7].mxu1 }
 0x6fe   : > { %v1175_v7 = vadd.f32 %v2032_v3, %v1174_v6  ;;  %v2064_v6 = vld [vmem:[%s2721_s1 + $0x78] sm:$0xff] }
 0x6ff   : > { %v2604_v9 = vadd.f32 %v1180_v5, %v2505_v2  ;;  %v1363_v2 = vld [vmem:[%s2730_s10] sm:$0xff] }
 0x700   : > { %v2601_v8 = vadd.f32 %v1175_v7, %v2503_v1  ;;  %v2036_v1 = vld [vmem:[%s2721_s1 + $0x48] sm:$0xff]  ;;  %v2331_v16 = vpack.c.bf16 %v1364_v14, %v1363_v2  ;;  %v2065_v7 = vld [vmem:[%s2721_s1 + $0x80] sm:$0xff] }
 0x702   : > { %2220 = vmatprep.mubr.msk.f32.mxu1 %vm473_vm0, %v2601_v8  ;;  %2332 = vmatprep.subr.bf16.mxu1 %v2331_v16 }
 0x703   : > { %2221 = vmatmul.mubr.msk.f32.vlgmr.msra.gmra.mrb[8].mxu1 %vm473_vm0, %v2604_v9 }
 0x704   : > { %2334 = vmatpush3.bf16.msra.mxu1 %v2331_v16 }
 0x705   : > { %2336 = vmatprep.subr.bf16.mxu1 %v2335_v18 }
 0x708   : > { %2338 = vmatpush3.bf16.msra.mxu1 %v2335_v18 }
 0x7d6   : > { %v2222_v11 = vpop.f32.mrb[8].mxu1 }
 0x7d7   : > { %v1261_v12 = vpop.f32.mrb[9].mxu1 }
 0x7d8   : > { %v2327_v13 = vpack.c.bf16 %v2222_v11, %v1261_v12  ;;  %v2067_v11 = vld [vmem:[%s2733_s13] ss:$0 sm:$0xff] }
 0x7da   : > { %2328 = vmatprep.subr.bf16.mxu0 %v2327_v13 }
 0x7db   : > { %2330 = vmatpush3.bf16.msra.mxu0 %v2327_v13 }
 0x7de   : > { %2228 = vmatmul.mubr.msk.f32.vlgmr.msra.gmra.mrb[8].mxu0 %vm562_vm1, %v2036_v1 }
 0x7df   : > { %2245 = vmatprep.mubr.msk.f32.mxu0 %vm562_vm1, %v2042_v26 }
 0x8b1   : > { %v2229_v20 = vpop.f32.mrb[8].mxu0 }
 0x8b2   : > { %v1355_v21 = vadd.f32 %v2229_v20, %v2039_v19  ;;  %v1349_v22 = vpop.f32.mrb[9].mxu0 }
 0x8b3   : > { %v1350_v23 = vadd.f32 %v2039_v19, %v1349_v22 }
 0x8b5   : > { %2388 = vtanh.f32 %v1350_v23 }
 0x8b6   : > { %2390 = vtanh.f32 %v1355_v21 }
 0x8bf   : > { %v2389_v24 = vpop.eup %2388 }
 0x8c0   : > { %v2391_v25 = vpop.eup %2390  ;;  %2238 = vmatprep.mubr.msk.f32.mxu1 %vm653_vm2, %v2389_v24 }
 0x8c1   : > { %2239 = vmatmul.mubr.msk.f32.vlgmr.msra.gmra.mrb[10].mxu1 %vm653_vm2, %v2391_v25 }
 0x8c2   : > { %2263 = vmatprep.mubr.msk.f32.mxu1 %vm562_vm1, %v2049_v44 }
 0x994   : > { %v2240_v27 = vpop.f32.mrb[10].mxu1 }
 0x995   : > { %v1439_v28 = vpop.f32.mrb[11].mxu1 }
 0x996   : > { %v2339_v29 = vpack.c.bf16 %v2240_v27, %v1439_v28 }
 0x998   : > { %2340 = vmatprep.subr.bf16.mxu0 %v2339_v29 }
 0x999   : > { %2342 = vmatpush3.bf16.msra.mxu0 %v2339_v29 }
 0x99a   : > { %2344 = vmatprep.subr.bf16.mxu0 %v2343_v34 }
 0x99c   : > { %2246 = vmatmul.mubr.msk.f32.vlgmr.msra.gmra.mrb[10].mxu0 %vm562_vm1, %v2043_v30 }
 0x99d   : > { %2346 = vmatpush3.bf16.msra.mxu0 %v2343_v34 }
 0x99e   : > { %2348 = vmatprep.subr.bf16.mxu0 %v2347_v36 }
 0x9a1   : > { %2350 = vmatpush3.bf16.msra.mxu0 %v2347_v36 }
 0xa6f   : > { %v2247_v38 = vpop.f32.mrb[10].mxu0 }
 0xa70   : > { %v1533_v39 = vadd.f32 %v2247_v38, %v2046_v37  ;;  %v1527_v40 = vpop.f32.mrb[11].mxu0 }
 0xa71   : > { %v1528_v41 = vadd.f32 %v2046_v37, %v1527_v40 }
 0xa73   : > { %2392 = vtanh.f32 %v1528_v41 }
 0xa74   : > { %2394 = vtanh.f32 %v1533_v39 }
 0xa7d   : > { %v2393_v42 = vpop.eup %2392 }
 0xa7e   : > { %v2395_v43 = vpop.eup %2394  ;;  %2256 = vmatprep.mubr.msk.f32.mxu0 %vm653_vm2, %v2393_v42 }
 0xa7f   : > { %2257 = vmatmul.mubr.msk.f32.vlgmr.msra.gmra.mrb[12].mxu0 %vm653_vm2, %v2395_v43 }
 0xa80   : > { %2281 = vmatprep.mubr.msk.f32.mxu0 %vm562_vm1, %v2063_v0 }
 0xb52   : > { %v2258_v45 = vpop.f32.mrb[12].mxu0 }
 0xb53   : > { %v1618_v46 = vpop.f32.mrb[13].mxu0 }
 0xb54   : > { %v2351_v47 = vpack.c.bf16 %v2258_v45, %v1618_v46 }
 0xb56   : > { %2352 = vmatprep.subr.bf16.mxu1 %v2351_v47 }
 0xb57   : > { %2354 = vmatpush3.bf16.msra.mxu1 %v2351_v47 }
 0xb58   : > { %2356 = vmatprep.subr.bf16.mxu1 %v2355_v52 }
 0xb5a   : > { %2264 = vmatmul.mubr.msk.f32.vlgmr.msra.gmra.mrb[12].mxu1 %vm562_vm1, %v2050_v48 }
 0xb5b   : > { %2358 = vmatpush3.bf16.msra.mxu1 %v2355_v52 }
 0xb5c   : > { %2360 = vmatprep.subr.bf16.mxu1 %v2359_v54 }
 0xb5f   : > { %2362 = vmatpush3.bf16.msra.mxu1 %v2359_v54 }
 0xc2d   : > { %v2265_v56 = vpop.f32.mrb[12].mxu1 }
 0xc2e   : > { %v1713_v57 = vadd.f32 %v2265_v56, %v2058_v55  ;;  %v1707_v58 = vpop.f32.mrb[13].mxu1 }
 0xc2f   : > { %v1708_v59 = vadd.f32 %v2058_v55, %v1707_v58 }
 0xc30   : > { %2396 = vtanh.f32 %v1713_v57 }
 0xc31   : > { %2398 = vtanh.f32 %v1708_v59 }
 0xc3a   : > { %v2397_v60 = vpop.eup %2396 }
 0xc3b   : > { %v2399_v61 = vpop.eup %2398  ;;  %v1719_v63 = vadd.f32 %v2397_v60, %v2391_v25 }
 0xc3c   : > { %v1718_v62 = vadd.f32 %v2399_v61, %v2389_v24 }
 0xc3e   : > { %2274 = vmatprep.mubr.msk.f32.mxu1 %vm653_vm2, %v1718_v62 }
 0xc3f   : > { %2275 = vmatmul.mubr.msk.f32.vlgmr.msra.gmra.mrb[14].mxu1 %vm653_vm2, %v1719_v63 }
 0xd12   : > { %v2276_v3 = vpop.f32.mrb[14].mxu1 }
 0xd13   : > { %v1796_v4 = vpop.f32.mrb[15].mxu1 }
 0xd14   : > { %v2363_v5 = vpack.c.bf16 %v2276_v3, %v1796_v4 }
 0xd16   : > { %2364 = vmatprep.subr.bf16.mxu0 %v2363_v5 }
 0xd17   : > { %2366 = vmatpush3.bf16.msra.mxu0 %v2363_v5 }
 0xd1a   : > { %2282 = vmatmul.mubr.msk.f32.vlgmr.msra.gmra.mrb[14].mxu0 %vm562_vm1, %v2064_v6 }
 0xd1b   : > { %2284 = vmatprep.mubr.msk.f32.mxu0 %vm562_vm1, %v2065_v7 }
 0xd1e   : > { %2285 = vmatmul.mubr.msk.f32.gmra.mrb[16].mxu0 %vm562_vm1, %v2066_v10 }
 0xded   : > { %v2283_v12 = vpop.f32.mrb[14].mxu0 }
 0xdee   : > { %v1896_v13 = vpop.f32.mrb[15].mxu0  ;;  %v1902_v2 = vadd.f32 %v2283_v12, %v2067_v11 }
 0xdef   : > { %v1897_v1 = vadd.f32 %v2067_v11, %v1896_v13 }
 0xdf0   : > { %v1916_v18 = vadd.f32 %v1902_v2, %v2604_v9 }
 0xdf1   : > { %v2286_v14 = vpop.f32.mrb[16].mxu0  ;;  %v1915_v15 = vadd.f32 %v1897_v1, %v2601_v8 }
 0xdf2   : > { %v1906_v16 = vpop.f32.mrb[17].mxu0  ;;  %v1912_v19 = vadd.f32 %v2286_v14, %v2067_v11 }
 0xdf3   : > { %v1907_v17 = vadd.f32 %v2067_v11, %v1906_v16  ;;  %1919 = vrot.lane.b32.xlu0 %v1915_v15, %s2408_s19 }
 0xdf5   : > { %1927 = vrot.lane.b32.xlu1 %v1907_v17, %s2408_s19 }
 0xdf7   : > { %1921 = vrot.lane.b32.xlu0 %v1916_v18, %s2408_s19 }
 0xdf9   : > { %1929 = vrot.lane.b32.xlu1 %v1912_v19, %s2408_s19 }
 0xe65   : > { %v1920_v20 = vpop.permute.xlu0 %1919 }
 0xe66   : > { %v1933_v21 = vsel %vm473_vm0, %v2601_v8, %v1920_v20 }
 0xe67   : > { %v1928_v22 = vpop.permute.xlu1 %1927 }
 0xe68   : > { %v1935_v23 = vsel %vm562_vm1, %v1933_v21, %v1928_v22 }
 0xe69   : > { %1938 = vst.msk [vmem:[%s467_s22] sm:$0xff] %vm1937_vm3, %v1935_v23  ;;  %v1922_v24 = vpop.permute.xlu0 %1921 }
 0xe6a   : > { %v1934_v25 = vsel %vm473_vm0, %v2604_v9, %v1922_v24 }
 0xe6b   : > { %v1930_v26 = vpop.permute.xlu1 %1929 }
 0xe6c   : > { %v1936_v27 = vsel %vm562_vm1, %v1934_v25, %v1930_v26 }
 0xe6d   : > { %1939 = vst.msk [vmem:[%s467_s22 + $0x8] sm:$0xff] %vm1937_vm3, %v1936_v27 }
 0xe6e PF: > { %s24_s29 = sadd.s32 1, %s2406_s29  }
 0xe6f   : > { %p21_p4 = scmp.ge.s32.totalorder %s24_s29, 4  }
 0xe71   :  { %23 = sbr.rel (!%p21_p4) target bundleno = 1 (0x1), region = 118 }

</bundles_post_ra>
